<compile_context>
chip_gen: v7x
topology: tpu7x:2x2x1
jax: 0.10.0
libtpu: 0.0.40
codegen_flags: <defaults>
</compile_context>

<pallas_src>
import functools

import jax
import jax.numpy as jnp
from jax.experimental import pallas as pl
from jax.experimental.pallas import tpu as pltpu

STATE_DIM = 4     # CartPole-v1 observation_space.shape[0]
ACTION_DIM = 2    # CartPole-v1 action_space.n
HIDDEN = 256
OUT_PAD = 128     # lane-dense padded output width (>= ACTION_DIM, multiple of 128)


def _round_up(x, m):
    return ((x + m - 1) // m) * m


def dqn_kernel(x_ref, w1_ref, b1_ref, w2_ref, b2_ref, w3_ref, b3_ref, out_ref):
    x = x_ref[...]                                   # (TB, STATE_DIM) f32

    # ---- fc1 on the VPU: K=4 contraction as 4 broadcast multiply-adds ----
    # (keeps the tiny contraction off the MXU; each w1 row is (1, HIDDEN))
    h1 = b1_ref[...] + x[:, 0:1] * w1_ref[0:1, :]
    for k in range(1, STATE_DIM):
        h1 = h1 + x[:, k:k + 1] * w1_ref[k:k + 1, :]
    h1 = jnp.maximum(h1, 0.0)                        # relu(fc1), f32 (TB, HIDDEN)

    # ---- fc2 on the MXU: bf16 inputs, f32 accumulation ----
    h2 = jnp.dot(h1.astype(jnp.bfloat16), w2_ref[...],
                 preferred_element_type=jnp.float32) + b2_ref[...]
    h2 = jnp.maximum(h2, 0.0)                        # relu(fc2), f32 (TB, HIDDEN)

    # ---- fc3 on the MXU into a lane-dense (TB, OUT_PAD) slab ----
    q = jnp.dot(h2.astype(jnp.bfloat16), w3_ref[...],
                preferred_element_type=jnp.float32) + b3_ref[...]
    out_ref[...] = q.astype(out_ref.dtype)


def prepare_params(params):
    """One-time prep: PyTorch (out,in) weights -> (in,out), bf16 MXU weights,
    2-D f32 biases, fc3 zero-padded to OUT_PAD output lanes."""
    w1 = jnp.asarray(params["w1"]).T.astype(jnp.float32)          # (4, 256)  VPU path
    b1 = jnp.asarray(params["b1"]).reshape(1, -1).astype(jnp.float32)
    w2 = jnp.asarray(params["w2"]).T.astype(jnp.bfloat16)         # (256, 256)
    b2 = jnp.asarray(params["b2"]).reshape(1, -1).astype(jnp.float32)
    w3 = jnp.asarray(params["w3"]).T.astype(jnp.bfloat16)         # (256, A)
    b3 = jnp.asarray(params["b3"]).reshape(1, -1).astype(jnp.float32)
    w3p = jnp.zeros((HIDDEN, OUT_PAD), jnp.bfloat16).at[:, :ACTION_DIM].set(w3)
    b3p = jnp.zeros((1, OUT_PAD), jnp.float32).at[:, :ACTION_DIM].set(b3)
    return {"w1": w1, "b1": b1, "w2": w2, "b2": b2, "w3p": w3p, "b3p": b3p}


@functools.partial(jax.jit, static_argnames=("block_b",))
def dqn_forward(x, prep, *, block_b=512):
    """x: (B, STATE_DIM) float32. prep: output of prepare_params()."""
    B = x.shape[0]
    x = x.astype(jnp.float32)

    # Batch tile: multiple of 8 (sublane), capped at block_b; pad B up to a
    # multiple of TB so every grid step sees a full tile.
    TB = min(block_b, _round_up(B, 8))
    B_pad = _round_up(B, TB)
    if B_pad != B:
        x = jnp.pad(x, ((0, B_pad - B), (0, 0)))
    grid = (B_pad // TB,)

    resident = lambda i: (0, 0)   # weights/biases: same block every grid step
    out_pad = pl.pallas_call(
        dqn_kernel,
        out_shape=jax.ShapeDtypeStruct((B_pad, OUT_PAD), jnp.float32),
        grid_spec=pltpu.PrefetchScalarGridSpec(
            num_scalar_prefetch=0,
            grid=grid,
            in_specs=[
                pl.BlockSpec((TB, STATE_DIM), lambda i: (i, 0)),   # x (streamed)
                pl.BlockSpec((STATE_DIM, HIDDEN), resident),        # w1 (f32)
                pl.BlockSpec((1, HIDDEN), resident),                # b1
                pl.BlockSpec((HIDDEN, HIDDEN), resident),           # w2 (bf16)
                pl.BlockSpec((1, HIDDEN), resident),                # b2
                pl.BlockSpec((HIDDEN, OUT_PAD), resident),          # w3 padded (bf16)
                pl.BlockSpec((1, OUT_PAD), resident),               # b3 padded
            ],
            out_specs=pl.BlockSpec((TB, OUT_PAD), lambda i: (i, 0)),
        ),
        compiler_params=pltpu.CompilerParams(
            dimension_semantics=("parallel",),   # v7x: shard batch over 2 TCs
        ),
    )(x, prep["w1"], prep["b1"], prep["w2"], prep["b2"], prep["w3p"], prep["b3p"])

    return out_pad[:B, :ACTION_DIM]


def init_params(key):
    """Deterministic init mimicking PyTorch Linear default (U[-1/sqrt(fan_in), +])."""
    ks = jax.random.split(key, 6)

    def lin(kw, kb, fan_in, fan_out):
        bound = 1.0 / jnp.sqrt(jnp.float32(fan_in))
        w = jax.random.uniform(kw, (fan_out, fan_in), jnp.float32, -bound, bound)
        b = jax.random.uniform(kb, (fan_out,), jnp.float32, -bound, bound)
        return w, b

    w1, b1 = lin(ks[0], ks[1], STATE_DIM, HIDDEN)
    w2, b2 = lin(ks[2], ks[3], HIDDEN, HIDDEN)
    w3, b3 = lin(ks[4], ks[5], HIDDEN, ACTION_DIM)
    return {"w1": w1, "b1": b1, "w2": w2, "b2": b2, "w3": w3, "b3": b3}


def dqn_reference(x, params):
    h1 = jnp.maximum(x @ params["w1"].T + params["b1"], 0.0)
    h2 = jnp.maximum(h1 @ params["w2"].T + params["b2"], 0.0)
    return h2 @ params["w3"].T + params["b3"]


if __name__ == "__main__":
    key = jax.random.PRNGKey(0)
    k_params, k_x1, k_x2 = jax.random.split(key, 3)
    params = init_params(k_params)
    prep = prepare_params(params)          # one-time weight prep (hoisted)

    # Small action-selection style batch.
    batch = 8
    x = jax.random.normal(k_x1, (batch, STATE_DIM), jnp.float32)
    q = dqn_forward(x, prep)
    jax.block_until_ready(q)
    q_ref = dqn_reference(x, params)
    assert q.shape == (batch, ACTION_DIM)
    assert jnp.allclose(q, q_ref, atol=5e-2, rtol=5e-2), float(jnp.max(jnp.abs(q - q_ref)))

    # Replay-buffer style batch (exercises the tiled grid + padding path).
    batch2 = 1000
    x2 = jax.random.normal(k_x2, (batch2, STATE_DIM), jnp.float32)
    q2 = dqn_forward(x2, prep)
    jax.block_until_ready(q2)
    q2_ref = dqn_reference(x2, params)
    assert q2.shape == (batch2, ACTION_DIM)
    assert jnp.allclose(q2, q2_ref, atol=5e-2, rtol=5e-2), float(jnp.max(jnp.abs(q2 - q2_ref)))

    print("KERNEL_OK")
</pallas_src>

<mosaic_0001>
module attributes {stable_mosaic.version = 11 : i64} {
  func.func @dqn_kernel(%arg0: i32, %arg1: memref<8x4xf32, #tpu.memory_space<vmem>>, %arg2: memref<4x256xf32, #tpu.memory_space<vmem>>, %arg3: memref<1x256xf32, #tpu.memory_space<vmem>>, %arg4: memref<256x256xbf16, #tpu.memory_space<vmem>>, %arg5: memref<1x256xf32, #tpu.memory_space<vmem>>, %arg6: memref<256x128xbf16, #tpu.memory_space<vmem>>, %arg7: memref<1x128xf32, #tpu.memory_space<vmem>>, %arg8: memref<8x128xf32, #tpu.memory_space<vmem>>) attributes {dimension_semantics = [#tpu.dimension_semantics<parallel>], iteration_bounds = array<i64: 1>, scalar_prefetch = 0 : i64, scratch_operands = 0 : i64, tpu.core_type = #tpu.core_type<tc>, window_params = [{transform_indices = @transform_0, window_bounds = array<i64: 8, 4>}, {pipeline_mode = #tpu.pipeline_mode<synchronous>, transform_indices = @transform_1, window_bounds = array<i64: 4, 256>}, {pipeline_mode = #tpu.pipeline_mode<synchronous>, transform_indices = @transform_2, window_bounds = array<i64: 1, 256>}, {pipeline_mode = #tpu.pipeline_mode<synchronous>, transform_indices = @transform_3, window_bounds = array<i64: 256, 256>}, {pipeline_mode = #tpu.pipeline_mode<synchronous>, transform_indices = @transform_4, window_bounds = array<i64: 1, 256>}, {pipeline_mode = #tpu.pipeline_mode<synchronous>, transform_indices = @transform_5, window_bounds = array<i64: 256, 128>}, {pipeline_mode = #tpu.pipeline_mode<synchronous>, transform_indices = @transform_6, window_bounds = array<i64: 1, 128>}, {transform_indices = @transform_7, window_bounds = array<i64: 8, 128>}]} {
    %c0 = arith.constant 0 : index
    %c0_0 = arith.constant 0 : index
    %0 = vector.load %arg1[%c0, %c0_0] : memref<8x4xf32, #tpu.memory_space<vmem>>, vector<8x4xf32>
    %c0_1 = arith.constant 0 : index
    %c0_2 = arith.constant 0 : index
    %1 = vector.load %arg3[%c0_1, %c0_2] : memref<1x256xf32, #tpu.memory_space<vmem>>, vector<1x256xf32>
    %2 = vector.extract_strided_slice %0 {offsets = [0, 0], sizes = [8, 1], strides = [1, 1]} : vector<8x4xf32> to vector<8x1xf32>
    %c0_3 = arith.constant 0 : index
    %c0_4 = arith.constant 0 : index
    %3 = vector.load %arg2[%c0_3, %c0_4] : memref<4x256xf32, #tpu.memory_space<vmem>>, vector<1x256xf32>
    %4 = vector.broadcast %2 : vector<8x1xf32> to vector<8x256xf32>
    %5 = vector.broadcast %3 : vector<1x256xf32> to vector<8x256xf32>
    %6 = arith.mulf %4, %5 : vector<8x256xf32>
    %7 = vector.broadcast %1 : vector<1x256xf32> to vector<8x256xf32>
    %8 = arith.addf %7, %6 : vector<8x256xf32>
    %9 = vector.extract_strided_slice %0 {offsets = [0, 1], sizes = [8, 1], strides = [1, 1]} : vector<8x4xf32> to vector<8x1xf32>
    %c1 = arith.constant 1 : index
    %c0_5 = arith.constant 0 : index
    %10 = vector.load %arg2[%c1, %c0_5] : memref<4x256xf32, #tpu.memory_space<vmem>>, vector<1x256xf32>
    %11 = vector.broadcast %9 : vector<8x1xf32> to vector<8x256xf32>
    %12 = vector.broadcast %10 : vector<1x256xf32> to vector<8x256xf32>
    %13 = arith.mulf %11, %12 : vector<8x256xf32>
    %14 = arith.addf %8, %13 : vector<8x256xf32>
    %15 = vector.extract_strided_slice %0 {offsets = [0, 2], sizes = [8, 1], strides = [1, 1]} : vector<8x4xf32> to vector<8x1xf32>
    %c2 = arith.constant 2 : index
    %c0_6 = arith.constant 0 : index
    %16 = vector.load %arg2[%c2, %c0_6] : memref<4x256xf32, #tpu.memory_space<vmem>>, vector<1x256xf32>
    %17 = vector.broadcast %15 : vector<8x1xf32> to vector<8x256xf32>
    %18 = vector.broadcast %16 : vector<1x256xf32> to vector<8x256xf32>
    %19 = arith.mulf %17, %18 : vector<8x256xf32>
    %20 = arith.addf %14, %19 : vector<8x256xf32>
    %21 = vector.extract_strided_slice %0 {offsets = [0, 3], sizes = [8, 1], strides = [1, 1]} : vector<8x4xf32> to vector<8x1xf32>
    %c3 = arith.constant 3 : index
    %c0_7 = arith.constant 0 : index
    %22 = vector.load %arg2[%c3, %c0_7] : memref<4x256xf32, #tpu.memory_space<vmem>>, vector<1x256xf32>
    %23 = vector.broadcast %21 : vector<8x1xf32> to vector<8x256xf32>
    %24 = vector.broadcast %22 : vector<1x256xf32> to vector<8x256xf32>
    %25 = arith.mulf %23, %24 : vector<8x256xf32>
    %26 = arith.addf %20, %25 : vector<8x256xf32>
    %cst = arith.constant 0.000000e+00 : f32
    %27 = vector.broadcast %cst : f32 to vector<8x256xf32>
    %28 = arith.maximumf %26, %27 : vector<8x256xf32>
    %29 = arith.truncf %28 : vector<8x256xf32> to vector<8x256xbf16>
    %c0_8 = arith.constant 0 : index
    %c0_9 = arith.constant 0 : index
    %30 = vector.load %arg4[%c0_8, %c0_9] : memref<256x256xbf16, #tpu.memory_space<vmem>>, vector<256x256xbf16>
    %cst_10 = arith.constant dense<0.000000e+00> : vector<8x256xf32>
    %31 = tpu.matmul %29, %30, %cst_10 {dimension_numbers = #tpu.dot_dimension_numbers<[1], [0], [0], [1], [0, 0, 1, 1], [], []>} : vector<8x256xbf16>, vector<256x256xbf16>, vector<8x256xf32> -> vector<8x256xf32>
    %c0_11 = arith.constant 0 : index
    %c0_12 = arith.constant 0 : index
    %32 = vector.load %arg5[%c0_11, %c0_12] : memref<1x256xf32, #tpu.memory_space<vmem>>, vector<1x256xf32>
    %33 = vector.broadcast %32 : vector<1x256xf32> to vector<8x256xf32>
    %34 = arith.addf %31, %33 : vector<8x256xf32>
    %cst_13 = arith.constant 0.000000e+00 : f32
    %35 = vector.broadcast %cst_13 : f32 to vector<8x256xf32>
    %36 = arith.maximumf %34, %35 : vector<8x256xf32>
    %37 = arith.truncf %36 : vector<8x256xf32> to vector<8x256xbf16>
    %c0_14 = arith.constant 0 : index
    %c0_15 = arith.constant 0 : index
    %38 = vector.load %arg6[%c0_14, %c0_15] : memref<256x128xbf16, #tpu.memory_space<vmem>>, vector<256x128xbf16>
    %cst_16 = arith.constant dense<0.000000e+00> : vector<8x128xf32>
    %39 = tpu.matmul %37, %38, %cst_16 {dimension_numbers = #tpu.dot_dimension_numbers<[1], [0], [0], [1], [0, 0, 1, 1], [], []>} : vector<8x256xbf16>, vector<256x128xbf16>, vector<8x128xf32> -> vector<8x128xf32>
    %c0_17 = arith.constant 0 : index
    %c0_18 = arith.constant 0 : index
    %40 = vector.load %arg7[%c0_17, %c0_18] : memref<1x128xf32, #tpu.memory_space<vmem>>, vector<1x128xf32>
    %41 = vector.broadcast %40 : vector<1x128xf32> to vector<8x128xf32>
    %42 = arith.addf %39, %41 : vector<8x128xf32>
    %c0_19 = arith.constant 0 : index
    %c0_20 = arith.constant 0 : index
    %43 = vector.load %arg8[%c0_19, %c0_20] : memref<8x128xf32, #tpu.memory_space<vmem>>, vector<8x128xf32>
    tpu.vector_store %arg8[%c0_19, %c0_20], %42 {strides = array<i32>} : memref<8x128xf32, #tpu.memory_space<vmem>>, vector<8x128xf32>,
    return
  }
  func.func @transform_0(%arg0: i32) -> (i32, i32) {
    %c0_i32 = arith.constant 0 : i32
    %c0_i32_0 = arith.constant 0 : i32
    return %arg0, %c0_i32 : i32, i32
  }
  func.func @transform_1(%arg0: i32) -> (i32, i32) {
    %c0_i32 = arith.constant 0 : i32
    %c0_i32_0 = arith.constant 0 : i32
    %c0_i32_1 = arith.constant 0 : i32
    return %c0_i32, %c0_i32_0 : i32, i32
  }
  func.func @transform_2(%arg0: i32) -> (i32, i32) {
    %c0_i32 = arith.constant 0 : i32
    %c0_i32_0 = arith.constant 0 : i32
    %c0_i32_1 = arith.constant 0 : i32
    return %c0_i32, %c0_i32_0 : i32, i32
  }
  func.func @transform_3(%arg0: i32) -> (i32, i32) {
    %c0_i32 = arith.constant 0 : i32
    %c0_i32_0 = arith.constant 0 : i32
    %c0_i32_1 = arith.constant 0 : i32
    return %c0_i32, %c0_i32_0 : i32, i32
  }
  func.func @transform_4(%arg0: i32) -> (i32, i32) {
    %c0_i32 = arith.constant 0 : i32
    %c0_i32_0 = arith.constant 0 : i32
    %c0_i32_1 = arith.constant 0 : i32
    return %c0_i32, %c0_i32_0 : i32, i32
  }
  func.func @transform_5(%arg0: i32) -> (i32, i32) {
    %c0_i32 = arith.constant 0 : i32
    %c0_i32_0 = arith.constant 0 : i32
    %c0_i32_1 = arith.constant 0 : i32
    return %c0_i32, %c0_i32_0 : i32, i32
  }
  func.func @transform_6(%arg0: i32) -> (i32, i32) {
    %c0_i32 = arith.constant 0 : i32
    %c0_i32_0 = arith.constant 0 : i32
    %c0_i32_1 = arith.constant 0 : i32
    return %c0_i32, %c0_i32_0 : i32, i32
  }
  func.func @transform_7(%arg0: i32) -> (i32, i32) {
    %c0_i32 = arith.constant 0 : i32
    %c0_i32_0 = arith.constant 0 : i32
    return %arg0, %c0_i32 : i32, i32
  }
}

</mosaic_0001>

<bundles_post_ra>
// kernel: dqn_forward.1
= control target key start
LH: loop header
LB: loop body
LE: loop exit
PB: predicated region body
PF: predicated region fallthrough
CT: control target
= control target key end

     0   :  { %12 = vsyncpa [#allocation3], 0  ;;  %s889_s0 = inlined_call_operand.vmem [shape: f32[8,4], index: 0, kind: input, shape index: {}]   ;;  %s890_s1 = inlined_call_operand.vmem [shape: f32[4,256], index: 1, kind: input, shape index: {}]   ;;  %s891_s2 = inlined_call_operand.vmem [shape: f32[1,256], index: 2, kind: input, shape index: {}]   ;;  %s892_s3 = inlined_call_operand.hbm [shape: bf16[256,256], index: 3, kind: input, shape index: {}]   ;;  %s893_s4 = inlined_call_operand.vmem [shape: f32[1,256], index: 4, kind: input, shape index: {}]   ;;  %s894_s5 = inlined_call_operand.hbm [shape: bf16[256,128], index: 5, kind: input, shape index: {}]   ;;  %s895_s6 = inlined_call_operand.vmem [shape: f32[1,128], index: 6, kind: input, shape index: {}]   ;;  %s896_s7 = inlined_call_operand.vmem [shape: f32[8,128], index: 7, kind: output, shape index: {}]  }
   0x1   :  { %13 = vsyncpa [#allocation5], 0  ;;  %s788_s24 = smov [#allocation2]   ;;  %s740_s28 = scalar_lea.hbm %s892_s3, 4096 }
   0x2   :  { %s25_s25 = sshll.u32 %s788_s24, 4  ;;  %p741_p0 = scmp.ne.s32.totalorder %s892_s3, %s740_s28  ;;  %s26_s25 = int_to_ptr.vmem [resolvable:$true] %s25_s25 }
   0x3   :  { %p744_p1 = scmp.lt.u32.totalorder %s740_s28, %s892_s3 }
   0x5   :  { %p746_p2 = pnand %p744_p1, %p741_p0 }
   0x7   :  { %749 = shalt.err (!%p746_p2)
}
   0x8   :  { %s750_s10 = scalar_lea.vmem %s26_s25, 4096  ;;  %p755_p4 = scmp.lt.s32.totalorder %s26_s25, %s26_s25 }
   0x9   :  { %p751_p3 = scmp.ne.s32.totalorder %s26_s25, %s750_s10  ;;  %p756_p5 = scmp.lt.s32.totalorder %s750_s10, %s750_s10 }
   0xb   :  { %p757_p6 = por %p756_p5, %p755_p4 }
   0xd   :  { %p758_p7 = pnand %p757_p6, %p751_p3 }
   0xf   :  { %761 = shalt.err (!%p758_p7)
}
  0x10   :  { %s789_s11 = smov 128   ;;  %s790_s12 = smov 8  }
  0x11   :  { %31 = dma.hbm_to_vmem [thread:$0]  %s892_s3, 4096, %s26_s25, [#allocation3], %s789_s11, %s789_s11, %s790_s12  }
  0x12   :  { %s791_s15 = smov [#allocation4]   ;;  %s762_s19 = scalar_lea.hbm %s894_s5, 2048 }
  0x13   :  { %s39_s16 = sshll.u32 %s791_s15, 4  ;;  %p763_p8 = scmp.ne.s32.totalorder %s894_s5, %s762_s19  ;;  %s40_s16 = int_to_ptr.vmem [resolvable:$true] %s39_s16 }
  0x14   :  { %p766_p9 = scmp.lt.u32.totalorder %s762_s19, %s894_s5 }
  0x16   :  { %p768_p10 = pnand %p766_p9, %p763_p8 }
  0x18   :  { %771 = shalt.err (!%p768_p10)
}
  0x19   :  { %s772_s24 = scalar_lea.vmem %s40_s16, 2048  ;;  %p777_p12 = scmp.lt.s32.totalorder %s40_s16, %s40_s16 }
  0x1a   :  { %p773_p11 = scmp.ne.s32.totalorder %s40_s16, %s772_s24  ;;  %p778_p13 = scmp.lt.s32.totalorder %s772_s24, %s772_s24 }
  0x1c   :  { %p779_p0 = por %p778_p13, %p777_p12 }
  0x1e   :  { %p780_p1 = pnand %p779_p0, %p773_p11 }
  0x20   :  { %783 = shalt.err (!%p780_p1)
}
  0x21   :  { %s792_s3 = smov 64   ;;  %s793_s25 = smov 4  }
  0x22   :  { %45 = dma.hbm_to_vmem [thread:$0]  %s894_s5, 2048, %s40_s16, [#allocation5], %s792_s3, %s792_s3, %s793_s25  }
  0x23   :  { %784 = dma.done.wait [#allocation3], 4096  }
  0x24   :  { %785 = vsyncadd [#allocation3], 4294963200 }
  0x25   :  { %786 = dma.done.wait [#allocation5], 2048  }
  0x26   :  { %787 = vsyncadd [#allocation5], 4294965248  ;;  %v794_v0 = vmov 0   ;;  %v795_v1 = vmov 2   ;;  %v55_v2 = vld [vmem:[%s889_s0] sm:$0xff]  ;;  %v796_v7 = vmov 1   ;;  %v64_v49 = vlaneseq }
  0x27   :  { %671 = vset.pattern.permute.xlu0 %v794_v0  ;;  %673 = vset.pattern.permute.xlu1 %v795_v1  ;;  %v676_v3 = vld [vmem:[#allocation2 + $0x4] ss:$8 sps:$4 sm:$0xff]   ;;  %v678_v4 = vld [vmem:[#allocation2] ss:$8 sps:$4 sm:$0xff]   ;;  %v679_v5 = vld [vmem:[#allocation2 + $0x14] ss:$8 sps:$4 sm:$0xff]  }
  0x28   :  { %60 = vperm.xlu0 %671, %v55_v2   ;;  %113 = vperm.xlu1 %673, %v55_v2   ;;  %v681_v6 = vld [vmem:[#allocation2 + $0x10] ss:$8 sps:$4 sm:$0xff]   ;;  %v797_v8 = vmov 3   ;;  %v682_v9 = vld [vmem:[#allocation2 + $0x24] ss:$8 sps:$4 sm:$0xff]   ;;  %v65_v50 = vshrl.u32 %v64_v49, 7 }
  0x29   :  { %360 = vmatprep.subr.bf16.mxu0 %v676_v3  ;;  %v684_v10 = vld [vmem:[#allocation2 + $0x20] ss:$8 sps:$4 sm:$0xff]   ;;  %v685_v11 = vld [vmem:[#allocation2 + $0x34] ss:$8 sps:$4 sm:$0xff]   ;;  %v687_v12 = vld [vmem:[#allocation2 + $0x30] ss:$8 sps:$4 sm:$0xff]  }
  0x2a   :  { %361 = vmatpush1.bf16.msra.mxu0 %v678_v4  ;;  %v688_v13 = vld [vmem:[#allocation2 + $0x44] ss:$8 sps:$4 sm:$0xff]   ;;  %v690_v14 = vld [vmem:[#allocation2 + $0x40] ss:$8 sps:$4 sm:$0xff]   ;;  %v691_v15 = vld [vmem:[#allocation2 + $0x54] ss:$8 sps:$4 sm:$0xff]  }
  0x2b   :  { %362 = vmatprep.subr.bf16.mxu0 %v679_v5  ;;  %v693_v16 = vld [vmem:[#allocation2 + $0x50] ss:$8 sps:$4 sm:$0xff]   ;;  %v694_v17 = vld [vmem:[#allocation2 + $0x64] ss:$8 sps:$4 sm:$0xff]   ;;  %v696_v18 = vld [vmem:[#allocation2 + $0x60] ss:$8 sps:$4 sm:$0xff]  }
  0x2c   :  { %672 = vset.pattern.permute.xlu0 %v796_v7  ;;  %674 = vset.pattern.permute.xlu1 %v797_v8  ;;  %v697_v19 = vld [vmem:[#allocation2 + $0x74] ss:$8 sps:$4 sm:$0xff]   ;;  %v724_v20 = vld [vmem:[#allocation4 + $0x40] sm:$0xff]   ;;  %v699_v22 = vld [vmem:[#allocation2 + $0x70] ss:$8 sps:$4 sm:$0xff]   ;;  %v66_v51 = vsub.s32 0, %v65_v50 }
  0x2d   :  { %92 = vperm.xlu0 %672, %v55_v2   ;;  %134 = vperm.xlu1 %674, %v55_v2   ;;  %v725_v21 = vld [vmem:[#allocation4] sm:$0xff]   ;;  %v726_v23 = vld [vmem:[#allocation4 + $0x48] sm:$0xff]   ;;  %v728_v25 = vld [vmem:[#allocation4 + $0x50] sm:$0xff]   ;;  %v70_v52 = vsub.s32 1, %v65_v50 }
  0x2e   :  { %363 = vmatpush1.bf16.msra.mxu0 %v681_v6  ;;  %639 = vmatprep.subr.bf16.mxu1 %v724_v20  ;;  %v727_v24 = vld [vmem:[#allocation4 + $0x8] sm:$0xff]   ;;  %v729_v28 = vld [vmem:[#allocation4 + $0x10] sm:$0xff]   ;;  %v730_v29 = vld [vmem:[#allocation4 + $0x58] sm:$0xff]  }
  0x2f   :  { %364 = vmatprep.subr.bf16.mxu0 %v682_v9  ;;  %640 = vmatpush3.bf16.msra.mxu1 %v725_v21  ;;  %v700_v26 = vld [vmem:[#allocation2 + $0x84] ss:$8 sps:$4 sm:$0xff]   ;;  %v702_v27 = vld [vmem:[#allocation2 + $0x80] ss:$8 sps:$4 sm:$0xff]   ;;  %v703_v30 = vld [vmem:[#allocation2 + $0x94] ss:$8 sps:$4 sm:$0xff]  }
  0x30   :  { %641 = vmatprep.subr.bf16.mxu1 %v726_v23  ;;  %v705_v31 = vld [vmem:[#allocation2 + $0x90] ss:$8 sps:$4 sm:$0xff]   ;;  %v706_v32 = vld [vmem:[#allocation2 + $0xa4] ss:$8 sps:$4 sm:$0xff]   ;;  %v708_v36 = vld [vmem:[#allocation2 + $0xa0] ss:$8 sps:$4 sm:$0xff]  }
  0x31   :  { %675 = vset.pattern.permute.xlu0 %v797_v8  ;;  %v731_v33 = vld [vmem:[#allocation4 + $0x18] sm:$0xff]   ;;  %v732_v34 = vld [vmem:[#allocation4 + $0x60] sm:$0xff]   ;;  %v734_v37 = vld [vmem:[#allocation4 + $0x68] sm:$0xff]  }
  0x32   :  { %365 = vmatpush1.bf16.msra.mxu0 %v684_v10  ;;  %v733_v35 = vld [vmem:[#allocation4 + $0x20] sm:$0xff]   ;;  %v709_v38 = vld [vmem:[#allocation2 + $0xb4] ss:$8 sps:$4 sm:$0xff]   ;;  %v735_v39 = vld [vmem:[#allocation4 + $0x28] sm:$0xff]  }
  0x33   :  { %366 = vmatprep.subr.bf16.mxu0 %v685_v11  ;;  %642 = vmatpush3.bf16.msra.mxu1 %v727_v24  ;;  %v711_v40 = vld [vmem:[#allocation2 + $0xb0] ss:$8 sps:$4 sm:$0xff]   ;;  %v712_v41 = vld [vmem:[#allocation2 + $0xc4] ss:$8 sps:$4 sm:$0xff]   ;;  %v714_v42 = vld [vmem:[#allocation2 + $0xc0] ss:$8 sps:$4 sm:$0xff]  }
  0x34   :  { %643 = vmatprep.subr.bf16.mxu1 %v728_v25  ;;  %v715_v43 = vld [vmem:[#allocation2 + $0xd4] ss:$8 sps:$4 sm:$0xff]   ;;  %v717_v44 = vld [vmem:[#allocation2 + $0xd0] ss:$8 sps:$4 sm:$0xff]   ;;  %v718_v45 = vld [vmem:[#allocation2 + $0xe4] ss:$8 sps:$4 sm:$0xff]  }
  0x35   :  { %v720_v46 = vld [vmem:[#allocation2 + $0xe0] ss:$8 sps:$4 sm:$0xff]   ;;  %v721_v47 = vld [vmem:[#allocation2 + $0xf4] ss:$8 sps:$4 sm:$0xff]   ;;  %v723_v48 = vld [vmem:[#allocation2 + $0xf0] ss:$8 sps:$4 sm:$0xff]  }
  0x36   :  { %367 = vmatpush1.bf16.msra.mxu0 %v687_v12  ;;  %v57_v53 = vld [vmem:[%s890_s1] ss:$4 sm:$0x3]  ;;  %v587_v57 = vld [vmem:[%s890_s1 + $0x1] ss:$4 sm:$0x3] }
  0x37   :  { %368 = vmatprep.subr.bf16.mxu0 %v688_v13  ;;  %644 = vmatpush3.bf16.msra.mxu1 %v729_v28  ;;  %v56_v54 = vld [vmem:[%s891_s2] sm:$0x3]  ;;  %v67_v55 = vrot.slane %v57_v53, %v66_v51  ;;  %v71_v56 = vrot.slane %v57_v53, %v70_v52  ;;  %v588_v59 = vld [vmem:[%s890_s1 + $0x2] ss:$4 sm:$0x3]  ;;  %v99_v2 = vrot.slane %v587_v57, %v66_v51  ;;  %v736_v28 = vld [vmem:[#allocation4 + $0x70] sm:$0xff]  }
  0x38   :  { %645 = vmatprep.subr.bf16.mxu1 %v730_v29  ;;  %v80_v61 = vrot.slane %v56_v54, %v66_v51  ;;  %v84_v62 = vrot.slane %v56_v54, %v70_v52  ;;  %v589_v63 = vld [vmem:[%s890_s1 + $0x3] ss:$4 sm:$0x3]  ;;  %v103_v3 = vrot.slane %v587_v57, %v70_v52  ;;  %v120_v4 = vrot.slane %v588_v59, %v66_v51  ;;  %v737_v29 = vld [vmem:[#allocation4 + $0x30] sm:$0xff]  }
  0x39   :  { %v124_v5 = vrot.slane %v588_v59, %v70_v52  ;;  %v141_v6 = vrot.slane %v589_v63, %v66_v51  ;;  %v145_v7 = vrot.slane %v589_v63, %v70_v52 }
  0x3a   :  { %369 = vmatpush1.bf16.msra.mxu0 %v690_v14 }
  0x3b   :  { %370 = vmatprep.subr.bf16.mxu0 %v691_v15  ;;  %646 = vmatpush3.bf16.msra.mxu1 %v731_v33 }
  0x3c   :  { %647 = vmatprep.subr.bf16.mxu1 %v732_v34 }
  0x3e   :  { %371 = vmatpush1.bf16.msra.mxu0 %v693_v16 }
  0x3f   :  { %372 = vmatprep.subr.bf16.mxu0 %v694_v17  ;;  %648 = vmatpush3.bf16.msra.mxu1 %v733_v35 }
  0x40   :  { %649 = vmatprep.subr.bf16.mxu1 %v734_v37 }
  0x42   :  { %373 = vmatpush1.bf16.msra.mxu0 %v696_v18 }
  0x43   :  { %374 = vmatprep.subr.bf16.mxu0 %v697_v19  ;;  %650 = vmatpush3.bf16.msra.mxu1 %v735_v39 }
  0x44   :  { %651 = vmatprep.subr.bf16.mxu1 %v736_v28 }
  0x46   :  { %375 = vmatpush1.bf16.msra.mxu0 %v699_v22 }
  0x47   :  { %376 = vmatprep.subr.bf16.mxu0 %v700_v26  ;;  %652 = vmatpush3.bf16.msra.mxu1 %v737_v29 }
  0x4a   :  { %377 = vmatpush1.bf16.msra.mxu0 %v702_v27 }
  0x4b   :  { %378 = vmatprep.subr.bf16.mxu0 %v703_v30  ;;  %v738_v30 = vld [vmem:[#allocation4 + $0x78] sm:$0xff]  }
  0x4c   :  { %653 = vmatprep.subr.bf16.mxu1 %v738_v30 }
  0x4e   :  { %379 = vmatpush1.bf16.msra.mxu0 %v705_v31  ;;  %v739_v31 = vld [vmem:[#allocation4 + $0x38] sm:$0xff]  }
  0x4f   :  { %380 = vmatprep.subr.bf16.mxu0 %v706_v32  ;;  %654 = vmatpush3.bf16.msra.mxu1 %v739_v31  ;;  %v188_v32 = vld [vmem:[%s893_s4] sm:$0x3] }
  0x50   :  { %v193_v33 = vrot.slane %v188_v32, %v66_v51  ;;  %v197_v34 = vrot.slane %v188_v32, %v70_v52 }
  0x52   :  { %381 = vmatpush1.bf16.msra.mxu0 %v708_v36 }
  0x53   :  { %382 = vmatprep.subr.bf16.mxu0 %v709_v38 }
  0x56   :  { %383 = vmatpush1.bf16.msra.mxu0 %v711_v40 }
  0x57   :  { %384 = vmatprep.subr.bf16.mxu0 %v712_v41 }
  0x5a   :  { %385 = vmatpush1.bf16.msra.mxu0 %v714_v42 }
  0x5b   :  { %386 = vmatprep.subr.bf16.mxu0 %v715_v43 }
  0x5e   :  { %387 = vmatpush1.bf16.msra.mxu0 %v717_v44 }
  0x5f   :  { %388 = vmatprep.subr.bf16.mxu0 %v718_v45 }
  0x62   :  { %389 = vmatpush1.bf16.msra.mxu0 %v720_v46  ;;  %v622_v46 = vld [vmem:[%s895_s6] ss:$0 sm:$0xff] }
  0x63   :  { %390 = vmatprep.subr.bf16.mxu0 %v721_v47 }
  0x66   :  { %391 = vmatpush1.bf16.msra.mxu0 %v723_v48 }
  0xa7   :  { %v61_v58 = vpop.permute.xlu0 %60  ;;  %v114_v60 = vpop.permute.xlu1 %113 }
  0xa8   :  { %v74_v0 = vmul.f32 %v67_v55, %v61_v58  ;;  %v75_v1 = vmul.f32 %v71_v56, %v61_v58  ;;  %v127_v14 = vmul.f32 %v120_v4, %v114_v60  ;;  %v128_v15 = vmul.f32 %v124_v5, %v114_v60 }
  0xaa   :  { %v87_v10 = vadd.f32 %v80_v61, %v74_v0  ;;  %v88_v11 = vadd.f32 %v84_v62, %v75_v1 }
  0xac   :  { %v93_v8 = vpop.permute.xlu0 %92  ;;  %v135_v9 = vpop.permute.xlu1 %134 }
  0xad   :  { %v106_v12 = vmul.f32 %v99_v2, %v93_v8  ;;  %v107_v13 = vmul.f32 %v103_v3, %v93_v8  ;;  %v148_v18 = vmul.f32 %v141_v6, %v135_v9  ;;  %v149_v19 = vmul.f32 %v145_v7, %v135_v9 }
  0xaf   :  { %v108_v16 = vadd.f32 %v106_v12, %v87_v10  ;;  %v109_v17 = vadd.f32 %v107_v13, %v88_v11 }
  0xb1   :  { %v129_v20 = vadd.f32 %v127_v14, %v108_v16  ;;  %v130_v21 = vadd.f32 %v128_v15, %v109_v17 }
  0xb3   :  { %v150_v22 = vadd.f32 %v148_v18, %v129_v20  ;;  %v151_v23 = vadd.f32 %v149_v19, %v130_v21 }
  0xb5   :  { %v152_v24 = vmax.f32 %v150_v22, 0.0  ;;  %v153_v25 = vmax.f32 %v151_v23, 0.0 }
  0xb7   :  { %v154_v26 = vpack.c.bf16 %v152_v24, %v152_v24  ;;  %v155_v27 = vpack.c.bf16 %v153_v25, %v153_v25 }
  0xb9   :  { %392 = vmatprep.mubr.bf16.mxu0 %v155_v27 }
  0xba   :  { %393 = vmatmul.mubr.bf16.vlgmr.msra.gmra.mrb[0].mxu0 %v154_v26 }
 0x18d   :  { %v394_v35 = vpop.f32.mrb[0].mxu0 }
 0x18e   :  { %v395_v36 = vadd.f32 %v394_v35, %v193_v33  ;;  %v396_v37 = vpop.f32.mrb[1].mxu0 }
 0x18f   :  { %v397_v38 = vadd.f32 %v396_v37, %v197_v34  ;;  %v398_v39 = vpop.f32.mrb[2].mxu0 }
 0x190   :  { %v401_v40 = vmax.f32 %v395_v36, 0.0  ;;  %v399_v41 = vpop.f32.mrb[3].mxu0 }
 0x191   :  { %v402_v42 = vmax.f32 %v397_v38, 0.0 }
 0x192   :  { %v403_v44 = vpack.c.bf16 %v401_v40, %v401_v40 }
 0x193   :  { %v404_v43 = vpack.c.bf16 %v402_v42, %v402_v42 }
 0x195   :  { %572 = vmatprep.mubr.bf16.mxu1 %v404_v43 }
 0x196   :  { %573 = vmatmul.mubr.bf16.vlgmr.msra.gmra.mrb[0].mxu1 %v403_v44 }
 0x269   :  { %v655_v45 = vpop.f32.mrb[0].mxu1 }
 0x26a   :  { %v656_v47 = vpop.f32.mrb[1].mxu1 }
 0x26b   :  { %v657_v48 = vadd.f32 %v656_v47, %v655_v45  ;;  %v658_v49 = vpop.f32.mrb[2].mxu1 }
 0x26c   :  { %v659_v50 = vpop.f32.mrb[3].mxu1 }
 0x26d   :  { %v575_v51 = vadd.f32 %v657_v48, %v622_v46 }
 0x26f   :  { %580 = vst [vmem:[%s896_s7] sm:$0xff] %v575_v51 }
 0x270   :  { %585 = vsyncpa [#allocation3], 1 }
 0x271   :  { %586 = vsyncpa [#allocation5], 1 }

</bundles_post_ra>
